<compile_context>
chip_gen: v5e
topology: v5e:2x2
jax: 0.10.0
libtpu: 0.0.40
codegen_flags: <defaults>
</compile_context>

<pallas_src>
import functools
import math

import jax
import jax.numpy as jnp
from jax import lax
from jax.experimental import pallas as pl
from jax.experimental.pallas import tpu as pltpu


def _round_up(x, m):
    return (x + m - 1) // m * m


def _tpu_generation():
    try:
        kind = jax.devices()[0].device_kind.lower()
    except Exception:
        return 6
    for g in (7, 6, 5, 4, 3, 2):
        if f"v{g}" in kind or f"tpu{g}" in kind:
            return g
    return 6


_GEN = _tpu_generation()          # 5 -> v5e, 6 -> v6e, 7 -> v7x (2 TCs)


# ----------------------------------------------------------------------------
# Shared epilogue (folded BN/bias, ReLU / sigmoid, post-ReLU BN, residual add)
# ----------------------------------------------------------------------------
def _epilogue(acc, t, s, r, mode, has_res):
    if mode == "relu_bn":
        # SN-Conv -> ReLU -> BN (attentive shortcut blocks): BN after ReLU.
        return jnp.maximum(acc, 0.0) * s + t
    y = acc + t                                   # conv (+bias / folded BN shift)
    if has_res:
        y = y + r.astype(jnp.float32)             # fused residual add
    if mode == "relu":
        y = jnp.maximum(y, 0.0)
    elif mode == "sigmoid":
        y = jax.nn.sigmoid(y)
    return y


# ----------------------------------------------------------------------------
# Pallas kernel 1: tiled bf16 matmul (f32 accumulate) + fused epilogue
# (used for 1x1 convs and the im2col fallback of strided/dilated convs)
# ----------------------------------------------------------------------------
def _mm_kernel(*refs, mode, has_res, has_scale):
    idx = 0
    a_ref = refs[idx]; idx += 1
    b_ref = refs[idx]; idx += 1
    s_ref = None
    if has_scale:
        s_ref = refs[idx]; idx += 1
    t_ref = refs[idx]; idx += 1
    r_ref = None
    if has_res:
        r_ref = refs[idx]; idx += 1
    o_ref = refs[idx]; idx += 1
    acc_ref = refs[idx]

    k = pl.program_id(2)

    @pl.when(k == 0)
    def _():
        acc_ref[...] = jnp.zeros_like(acc_ref)

    acc_ref[...] += jnp.dot(a_ref[...], b_ref[...],
                            preferred_element_type=jnp.float32)

    @pl.when(k == pl.num_programs(2) - 1)
    def _():
        y = _epilogue(acc_ref[...], t_ref[...],
                      s_ref[...] if has_scale else None,
                      r_ref[...] if has_res else None,
                      mode, has_res)
        o_ref[...] = y.astype(o_ref.dtype)


def _matmul_fused(a, b, shift, *, scale=None, mode="none", residual=None,
                  out_dtype=jnp.bfloat16):
    """out = epilogue(a @ b).  a: (M, K); b: (K, cout) bf16 (scale pre-folded);
    shift/scale: (1, cout) f32; residual: optional (M, cout)."""
    M, K = a.shape
    Kb, Ncols = b.shape
    assert K == Kb, (K, Kb)
    has_scale = scale is not None
    has_res = residual is not None
    if mode == "relu_bn":
        assert has_scale and not has_res

    # ---- tile selection --------------------------------------------------
    if Ncols % 128 == 0:
        tn = 256 if (Ncols % 256 == 0 and _GEN >= 6) else 128   # v5e: 128-wide MXU
    else:
        tn = Ncols                       # lane full-dim exemption: no N pad / slice
    if K % 128 == 0:
        tk = next(c for c in (1024, 512, 256, 128) if K % c == 0)
    else:
        tk = K                           # single K block, no K padding
    if M <= 512:
        tm = M                           # single M block, no pad, no post-slice
    else:
        tm = 512
        for cand in range(512, 15, -16):         # largest 16-multiple dividing M
            if M % cand == 0:
                tm = cand
                break
    if _GEN >= 7:                        # keep both v7x TensorCores busy
        mb, nb = pl.cdiv(M, tm), Ncols // tn
        if (mb * nb) % 2 == 1 and tm % 32 == 0:
            tm //= 2
    Mp = _round_up(M, tm)

    a = a.astype(jnp.bfloat16)
    if Mp != M:
        a = jnp.pad(a, ((0, Mp - M), (0, 0)))

    inputs = [a, b]
    in_specs = [pl.BlockSpec((tm, tk), lambda i, j, k: (i, k)),
                pl.BlockSpec((tk, tn), lambda i, j, k: (k, j))]
    if has_scale:
        inputs.append(scale)
        in_specs.append(pl.BlockSpec((1, tn), lambda i, j, k: (0, j)))
    inputs.append(shift)
    in_specs.append(pl.BlockSpec((1, tn), lambda i, j, k: (0, j)))
    if has_res:
        r = residual.astype(jnp.bfloat16)
        if Mp != M:
            r = jnp.pad(r, ((0, Mp - M), (0, 0)))
        inputs.append(r)
        # block index independent of k -> fetched once per (i, j) tile.
        in_specs.append(pl.BlockSpec((tm, tn), lambda i, j, k: (i, j)))

    grid = (Mp // tm, Ncols // tn, K // tk)
    out = pl.pallas_call(
        functools.partial(_mm_kernel, mode=mode, has_res=has_res,
                          has_scale=has_scale),
        out_shape=jax.ShapeDtypeStruct((Mp, Ncols), out_dtype),
        grid_spec=pltpu.PrefetchScalarGridSpec(
            num_scalar_prefetch=0,
            grid=grid,
            in_specs=in_specs,
            out_specs=pl.BlockSpec((tm, tn), lambda i, j, k: (i, j)),
            scratch_shapes=[pltpu.VMEM((tm, tn), jnp.float32)],
        ),
        compiler_params=pltpu.CompilerParams(
            dimension_semantics=("parallel", "parallel", "arbitrary")),
    )(*inputs)
    if Mp != M:
        out = out[:M]
    return out


# ----------------------------------------------------------------------------
# Pallas kernel 2: fused 3x3 stride-1 conv (no im2col) + fused epilogue
# ----------------------------------------------------------------------------
def _conv3_kernel(*refs, mode, has_res, has_scale, H, W):
    idx = 0
    x_ref = refs[idx]; idx += 1          # (1, H+2, W+2, tk) padded input block
    w_ref = refs[idx]; idx += 1          # (9, tk, tn) per-tap weights
    s_ref = None
    if has_scale:
        s_ref = refs[idx]; idx += 1
    t_ref = refs[idx]; idx += 1
    r_ref = None
    if has_res:
        r_ref = refs[idx]; idx += 1
    o_ref = refs[idx]; idx += 1          # (1, H, W, tn)
    acc_ref = refs[idx]                  # (H*W, tn) f32

    k = pl.program_id(2)
    tk = w_ref.shape[1]

    @pl.when(k == 0)
    def _():
        acc_ref[...] = jnp.zeros_like(acc_ref)

    # single accumulator read-modify-write per cin chunk, 9 MXU pushes
    acc = acc_ref[...]
    for t in range(9):
        i, j = divmod(t, 3)
        win = x_ref[0, i:i + H, j:j + W, :]                     # shifted window
        acc = acc + jnp.dot(win.reshape(H * W, tk), w_ref[t],
                            preferred_element_type=jnp.float32)
    acc_ref[...] = acc

    @pl.when(k == pl.num_programs(2) - 1)
    def _():
        r2d = r_ref[0].reshape(H * W, -1) if has_res else None
        y = _epilogue(acc_ref[...], t_ref[...],
                      s_ref[...] if has_scale else None,
                      r2d, mode, has_res)
        o_ref[0] = y.reshape(H, W, y.shape[-1]).astype(o_ref.dtype)


def _conv3_tiles(cin, cout):
    if cin % 128 == 0:
        tk = next(c for c in (512, 256, 128) if cin % c == 0)
    else:
        tk = cin                      # full-dim exemption: no channel padding
    if cout % 128 == 0:
        tn = 256 if (cout % 256 == 0 and _GEN >= 6) else 128
    else:
        tn = cout
    return tk, tn


def _fused3_vmem_ok(H, W, cin, cout, has_res, out_bytes):
    tk, tn = _conv3_tiles(cin, cout)
    vmem = (2 * (H + 2) * (W + 2) * tk * 2 +   # input block (double-buffered, bf16)
            2 * 9 * tk * tn * 2 +              # per-tap weights
            H * W * tn * 4 +                   # f32 accumulator
            2 * H * W * tn * out_bytes +       # output block
            (2 * H * W * tn * 2 if has_res else 0))
    return vmem <= 20 * 1024 * 1024


def _conv3x3_s1(x, p, *, mode, residual, out_dtype):
    N, H, W, cin = x.shape
    cout = p["cout"]
    tk, tn = _conv3_tiles(cin, cout)
    xp = jnp.pad(x, ((0, 0), (1, 1), (1, 1), (0, 0)))   # only spatial halo pad
    has_scale = (mode == "relu_bn")
    has_res = residual is not None

    inputs = [xp, p["w_tap"]]
    in_specs = [
        pl.BlockSpec((1, H + 2, W + 2, tk), lambda n, j, k: (n, 0, 0, k)),
        pl.BlockSpec((9, tk, tn), lambda n, j, k: (0, k, j)),
    ]
    if has_scale:
        inputs.append(p["scale"])
        in_specs.append(pl.BlockSpec((1, tn), lambda n, j, k: (0, j)))
    inputs.append(p["shift"])
    in_specs.append(pl.BlockSpec((1, tn), lambda n, j, k: (0, j)))
    if has_res:
        inputs.append(residual.astype(jnp.bfloat16))
        in_specs.append(pl.BlockSpec((1, H, W, tn), lambda n, j, k: (n, 0, 0, j)))

    grid = (N, cout // tn, cin // tk)
    return pl.pallas_call(
        functools.partial(_conv3_kernel, mode=mode, has_res=has_res,
                          has_scale=has_scale, H=H, W=W),
        out_shape=jax.ShapeDtypeStruct((N, H, W, cout), out_dtype),
        grid_spec=pltpu.PrefetchScalarGridSpec(
            num_scalar_prefetch=0,
            grid=grid,
            in_specs=in_specs,
            out_specs=pl.BlockSpec((1, H, W, tn), lambda n, j, k: (n, 0, 0, j)),
            scratch_shapes=[pltpu.VMEM((H * W, tn), jnp.float32)],
        ),
        compiler_params=pltpu.CompilerParams(
            dimension_semantics=("parallel", "parallel", "arbitrary")),
    )(*inputs)


# ----------------------------------------------------------------------------
# Conv-as-kernel + glue
# ----------------------------------------------------------------------------
# TODO(synk): channel-concat fusion (split-K across multiple input tensors) is
# not implemented; with im2col gone the concats only cost 1x activation bytes.
def _im2col(x, kh, kw, stride, dilation, padding):
    N, H, W, C = x.shape
    xp = jnp.pad(x, ((0, 0), (padding, padding), (padding, padding), (0, 0))) if padding else x
    Ho = (H + 2 * padding - dilation * (kh - 1) - 1) // stride + 1
    Wo = (W + 2 * padding - dilation * (kw - 1) - 1) // stride + 1
    cols = []
    for i in range(kh):
        for j in range(kw):
            cols.append(xp[:, i * dilation: i * dilation + (Ho - 1) * stride + 1: stride,
                           j * dilation: j * dilation + (Wo - 1) * stride + 1: stride, :])
    return jnp.concatenate(cols, axis=-1), Ho, Wo


def conv2d(x, p, stride=1, dilation=1, padding=0, mode="none", residual=None,
           out_dtype=jnp.bfloat16):
    kh, kw, cin, cout = p["kh"], p["kw"], p["cin"], p["cout"]
    if mode == "relu_bn":
        assert residual is None, "relu_bn epilogue does not support a residual"
    x = x.astype(jnp.bfloat16)
    N, H, W, C = x.shape
    assert C == cin, (C, cin)

    if (kh == 3 and kw == 3 and stride == 1 and dilation == 1 and padding == 1
            and "w_tap" in p
            and _fused3_vmem_ok(H, W, cin, cout, residual is not None,
                                jnp.dtype(out_dtype).itemsize)):
        return _conv3x3_s1(x, p, mode=mode, residual=residual, out_dtype=out_dtype)

    # fallback: 1x1 reshape / materialized im2col -> fused matmul
    # TODO(synk): strided / dilated convs still materialize an im2col matrix.
    if kh == 1 and kw == 1 and stride == 1 and padding == 0:
        Ho, Wo = H, W
        a = x.reshape(-1, cin)
    else:
        cols, Ho, Wo = _im2col(x, kh, kw, stride, dilation, padding)
        a = cols.reshape(-1, kh * kw * cin)
    res2d = residual.reshape(-1, cout) if residual is not None else None
    scale = p["scale"] if mode == "relu_bn" else None
    out = _matmul_fused(a, p["w_mm"], p["shift"], scale=scale, mode=mode,
                        residual=res2d, out_dtype=out_dtype)
    return out.reshape(N, Ho, Wo, cout)


def resize_bilinear(x, out_h, out_w):
    # F.interpolate(mode='bilinear', align_corners=False) equivalent (no AA).
    return jax.image.resize(x, (x.shape[0], out_h, out_w, x.shape[3]),
                            method="bilinear", antialias=False)


def maxpool3x3s2(x):
    return lax.reduce_window(x, jnp.array(-jnp.inf, dtype=x.dtype), lax.max,
                             (1, 3, 3, 1), (1, 2, 2, 1),
                             [(0, 0), (1, 1), (1, 1), (0, 0)])


# ----------------------------------------------------------------------------
# Deterministic parameter construction (BN folded into weights where possible)
# ----------------------------------------------------------------------------
class RNG:
    def __init__(self, seed):
        self.key = jax.random.PRNGKey(seed)

    def next(self):
        self.key, sub = jax.random.split(self.key)
        return sub


def _spectral_norm(w_oihw):
    cout = w_oihw.shape[0]
    m = w_oihw.reshape(cout, -1)
    u = jnp.ones((cout,), jnp.float32) / math.sqrt(cout)
    v = None
    for _ in range(3):
        v = m.T @ u
        v = v / (jnp.linalg.norm(v) + 1e-12)
        u = m @ v
        u = u / (jnp.linalg.norm(u) + 1e-12)
    sigma = u @ (m @ v)
    return w_oihw / sigma


def _pack_w_mm(w_oihw, scale=None):
    cout, cin, kh, kw = w_oihw.shape
    if scale is not None:
        w_oihw = w_oihw * scale[:, None, None, None]
    w2 = jnp.transpose(w_oihw, (2, 3, 1, 0)).reshape(kh * kw * cin, cout)
    return w2.astype(jnp.bfloat16)


def _pack_w_tap(w_oihw, scale=None):
    cout, cin, kh, kw = w_oihw.shape
    if scale is not None:
        w_oihw = w_oihw * scale[:, None, None, None]
    w = jnp.transpose(w_oihw, (2, 3, 1, 0))           # (kh, kw, cin, cout)
    return w.reshape(kh * kw, cin, cout).astype(jnp.bfloat16)


def make_conv(rng, cin, cout, k, *, bias=False, spectral=False,
              with_bn=False, fold_bn=True):
    std = math.sqrt(2.0 / (k * k * cin))
    w = jax.random.normal(rng.next(), (cout, cin, k, k), jnp.float32) * std
    if spectral:
        w = _spectral_norm(w)
    b = (jax.random.normal(rng.next(), (cout,), jnp.float32) * 0.01
         if bias else jnp.zeros((cout,), jnp.float32))

    p = {"kh": k, "kw": k, "cin": cin, "cout": cout}
    fold_scale = None
    shift = b
    if with_bn:
        gamma = 1.0 + 0.1 * jax.random.normal(rng.next(), (cout,), jnp.float32)
        beta = 0.1 * jax.random.normal(rng.next(), (cout,), jnp.float32)
        mean = 0.1 * jax.random.normal(rng.next(), (cout,), jnp.float32)
        var = 1.0 + 0.1 * jnp.abs(jax.random.normal(rng.next(), (cout,), jnp.float32))
        s = gamma * lax.rsqrt(var + 1e-5)
        sh = beta - mean * s
        if fold_bn:
            # conv -> BN: fold scale into the weight, bias into the shift.
            fold_scale = s
            shift = sh + s * b
        else:
            # conv -> ReLU -> BN (shortcut blocks): keep the affine in epilogue.
            assert not bias
            p["scale"] = s.reshape(1, cout).astype(jnp.float32)
            shift = sh
    p["shift"] = shift.reshape(1, cout).astype(jnp.float32)
    p["w_mm"] = _pack_w_mm(w, fold_scale)
    if k == 3:
        p["w_tap"] = _pack_w_tap(w, fold_scale)
    return p


# ------------------------------- ResNet50 encoder ---------------------------
def make_bottleneck(rng, inplanes, planes, stride, dilation, downsample):
    p = {"conv1": make_conv(rng, inplanes, planes, 1, with_bn=True),
         "conv2": make_conv(rng, planes, planes, 3, with_bn=True),
         "conv3": make_conv(rng, planes, planes * 4, 1, with_bn=True),
         "stride": stride, "dilation": dilation}
    if downsample:
        p["down"] = make_conv(rng, inplanes, planes * 4, 1, with_bn=True)
    return p


def bottleneck_fwd(x, p):
    if "down" in p:
        idt = conv2d(x, p["down"], stride=p["stride"])
    else:
        idt = x
    out = conv2d(x, p["conv1"], mode="relu")
    out = conv2d(out, p["conv2"], stride=p["stride"], dilation=p["dilation"],
                 padding=p["dilation"], mode="relu")
    # residual add + ReLU fused into the last conv's epilogue
    out = conv2d(out, p["conv3"], mode="relu", residual=idt)
    return out


def make_resnet50(rng, in_channels):
    p = {"conv1": make_conv(rng, in_channels, 64, 7, with_bn=True)}
    state = {"inplanes": 64, "dilation": 1}

    def layer(planes, blocks, stride, dilate):
        prev = state["dilation"]
        if dilate:
            state["dilation"] *= stride
            stride = 1
        blks = []
        ds = (stride != 1) or (state["inplanes"] != planes * 4)
        blks.append(make_bottleneck(rng, state["inplanes"], planes, stride, prev, ds))
        state["inplanes"] = planes * 4
        for _ in range(1, blocks):
            blks.append(make_bottleneck(rng, state["inplanes"], planes, 1,
                                        state["dilation"], False))
        return blks

    p["layer1"] = layer(64, 3, 1, False)
    p["layer2"] = layer(128, 4, 2, False)
    p["layer3"] = layer(256, 6, 2, False)
    p["layer4"] = layer(512, 3, 2, True)   # replace_stride_with_dilation on layer4
    return p


def resnet_fwd(x, p):
    x0 = x
    x = conv2d(x, p["conv1"], stride=2, padding=3, mode="relu")
    x1 = x
    x = maxpool3x3s2(x)
    for b in p["layer1"]:
        x = bottleneck_fwd(x, b)
    x2 = x
    for b in p["layer2"]:
        x = bottleneck_fwd(x, b)
    x3 = x
    for b in p["layer3"]:
        x = bottleneck_fwd(x, b)
    for b in p["layer4"]:
        x = bottleneck_fwd(x, b)
    x4 = x
    return x4, x3, x2, x1, x0


# ----------------------------------- ASPP -----------------------------------
def make_aspp(rng, cin, rates):
    p = {"rates": rates,
         "b0": make_conv(rng, cin, 256, 1, with_bn=True),
         "pool": make_conv(rng, cin, 256, 1, with_bn=True),
         "proj": make_conv(rng, 256 * (2 + len(rates)), 256, 1, with_bn=True)}
    for i, _ in enumerate(rates):
        p[f"b{i + 1}"] = make_conv(rng, cin, 256, 3, with_bn=True)
    return p


def aspp_fwd(x, p):
    feats = [conv2d(x, p["b0"], mode="relu")]
    for i, r in enumerate(p["rates"]):
        feats.append(conv2d(x, p[f"b{i + 1}"], dilation=r, padding=r, mode="relu"))
    g = jnp.mean(x.astype(jnp.float32), axis=(1, 2), keepdims=True)
    g = conv2d(g, p["pool"], mode="relu")
    g = jnp.broadcast_to(g, (x.shape[0], x.shape[1], x.shape[2], g.shape[3]))
    feats.append(g)
    cat = jnp.concatenate(feats, axis=-1)
    out = conv2d(cat, p["proj"], mode="relu")
    # Dropout(0.5) in ASPP is identity at inference.
    return out


# ---------------------------------- Decoder ---------------------------------
def make_decoder(rng, channels, feature_channels):
    return {
        "conv1": make_conv(rng, feature_channels[0] + channels[0], channels[1], 3, with_bn=True),
        "conv2": make_conv(rng, feature_channels[1] + channels[1], channels[2], 3, with_bn=True),
        "conv3": make_conv(rng, feature_channels[2] + channels[2], channels[3], 3, with_bn=True),
        "conv4": make_conv(rng, feature_channels[3] + channels[3], channels[4], 3, bias=True),
    }


def decoder_fwd(x, x3, x2, x1, x0, p):
    x = resize_bilinear(x, x3.shape[1], x3.shape[2])
    x = jnp.concatenate([x, x3], axis=-1)
    x = conv2d(x, p["conv1"], padding=1, mode="relu")
    x = resize_bilinear(x, x2.shape[1], x2.shape[2])
    x = jnp.concatenate([x, x2], axis=-1)
    x = conv2d(x, p["conv2"], padding=1, mode="relu")
    x = resize_bilinear(x, x1.shape[1], x1.shape[2])
    x = jnp.concatenate([x, x1], axis=-1)
    x = conv2d(x, p["conv3"], padding=1, mode="relu")
    x = resize_bilinear(x, x0.shape[1], x0.shape[2])
    x = jnp.concatenate([x, x0], axis=-1)
    # HumanMatting only consumes sigmoid(channel 0); sigmoid fused, bf16 output.
    x = conv2d(x, p["conv4"], padding=1, mode="sigmoid", out_dtype=jnp.bfloat16)
    return x


# ------------------------ Attentive shortcut + ECA --------------------------
def _eca_ksize(channel, gamma=2, b=1):
    t = int(abs((math.log2(channel) + b) / gamma))
    return t if t % 2 else t + 1


def make_shortcut(rng, inplane, planes):
    k = _eca_ksize(planes)
    return {"conv1": make_conv(rng, inplane, planes, 3, spectral=True,
                               with_bn=True, fold_bn=False),
            "conv2": make_conv(rng, planes, planes, 3, spectral=True,
                               with_bn=True, fold_bn=False),
            "eca_k": k,
            "eca_w": jax.random.normal(rng.next(), (k,), jnp.float32) * 0.3}


def shortcut_fwd(x, p):
    # Sequential(SN-Conv, ReLU, BN, SN-Conv, ReLU, BN, ECA): post-ReLU BN fused
    # into the conv epilogue via mode="relu_bn".
    y = conv2d(x, p["conv1"], padding=1, mode="relu_bn")
    y = conv2d(y, p["conv2"], padding=1, mode="relu_bn")
    # ECA channel attention (tiny; kept in XLA, computed in f32)
    C = y.shape[-1]
    gap = jnp.mean(y.astype(jnp.float32), axis=(1, 2))        # (N, C)
    k, w = p["eca_k"], p["eca_w"]
    pad = k // 2
    gp = jnp.pad(gap, ((0, 0), (pad, pad)))
    att = sum(w[i] * gp[:, i:i + C] for i in range(k))
    att = jax.nn.sigmoid(att)
    return y * att[:, None, None, :].astype(y.dtype)


# ------------------------------- MattingRefiner ------------------------------
# TODO(synk): exact MattingRefiner definition was not provided with the module;
# this is a structurally faithful BasicBlock U-decoder using layers [.,3,3,2,2,2]
# (layer1 deleted, as in HumanMatting.__init__) fusing the five shortcut features.
def make_basicblock(rng, c):
    return {"conv1": make_conv(rng, c, c, 3, with_bn=True),
            "conv2": make_conv(rng, c, c, 3, with_bn=True)}


def basicblock_fwd(x, p):
    y = conv2d(x, p["conv1"], padding=1, mode="relu")
    # residual add + ReLU fused into the second conv's epilogue
    y = conv2d(y, p["conv2"], padding=1, mode="relu", residual=x)
    return y


def make_refiner(rng, layers):
    chans = [(256, 128), (128, 64), (64, 32), (32, 32), (32, 32)]
    stages = []
    for idx, (cin, cout) in enumerate(chans):
        stages.append({
            "trans": make_conv(rng, cin, cout, 1, with_bn=True),
            "blocks": [make_basicblock(rng, cout) for _ in range(layers[idx + 1])],
        })
    return {"stages": stages, "head": make_conv(rng, 32, 1, 3, bias=True)}


def refiner_fwd(x4, mid3, mid2, mid1, mid0, mid, p):
    skips = [mid3, mid2, mid1, mid0, mid]
    x = x4
    for stage, skip in zip(p["stages"], skips):
        x = conv2d(x, stage["trans"], mode="relu")
        x = resize_bilinear(x, skip.shape[1], skip.shape[2])
        x = x + skip
        for b in stage["blocks"]:
            x = basicblock_fwd(x, b)
    alpha = conv2d(x, p["head"], padding=1, mode="sigmoid", out_dtype=jnp.bfloat16)
    return {"alpha": alpha}


# ------------------------------- HumanMatting --------------------------------
def make_human_matting_params(seed=42):
    rng = RNG(seed)
    params = {
        "backbone": make_resnet50(rng, 3),
        "aspp": make_aspp(rng, 2048, [3, 6, 9]),
        "decoder": make_decoder(rng, [256, 128, 64, 48, 1 + 1 + 32], [512, 256, 64, 3]),
        "shortcut": [make_shortcut(rng, ip, pl_) for ip, pl_ in
                     zip([4, 4, 65, 257, 513], [32, 32, 32, 64, 128])],
        "refine": make_refiner(rng, [2, 3, 3, 2, 2, 2]),
    }
    return params


def human_matting_forward(params, image_nchw, mask=None):
    image = jnp.transpose(image_nchw.astype(jnp.float32), (0, 2, 3, 1))   # NCHW -> NHWC
    image = image.astype(jnp.bfloat16)
    N, H, W, _ = image.shape

    image_quarter = resize_bilinear(image, H // 4, W // 4)
    x4, x3, x2, x1, x0 = resnet_fwd(image_quarter, params["backbone"])
    x4 = aspp_fwd(x4, params["aspp"])

    if mask is None:
        seg = decoder_fwd(x4, x3, x2, x1, x0, params["decoder"])   # sigmoid fused
        pred_seg = seg[..., 0:1]
        pred_seg = resize_bilinear(pred_seg, H, W)
        mask = (pred_seg > 0.5).astype(jnp.float32)
        mask_quarter = resize_bilinear(mask, H // 4, W // 4)
    else:
        mask = jnp.transpose(mask.astype(jnp.float32), (0, 2, 3, 1))
        pred_seg = mask
        mask_quarter = resize_bilinear(mask, H // 4, W // 4)

    m = mask.astype(jnp.bfloat16)
    mid_fea = shortcut_fwd(jnp.concatenate([image, m], axis=-1), params["shortcut"][0])

    m0 = mask_quarter.astype(jnp.bfloat16)
    mid_fea0 = shortcut_fwd(jnp.concatenate([x0, m0], axis=-1), params["shortcut"][1])

    m1 = resize_bilinear(m0, m0.shape[1] // 2, m0.shape[2] // 2)
    mid_fea1 = shortcut_fwd(jnp.concatenate([x1, m1], axis=-1), params["shortcut"][2])

    m2 = resize_bilinear(m0, m0.shape[1] // 4, m0.shape[2] // 4)
    mid_fea2 = shortcut_fwd(jnp.concatenate([x2, m2], axis=-1), params["shortcut"][3])

    m3 = resize_bilinear(m0, m0.shape[1] // 8, m0.shape[2] // 8)
    mid_fea3 = shortcut_fwd(jnp.concatenate([x3, m3], axis=-1), params["shortcut"][4])

    pred = refiner_fwd(x4, mid_fea3, mid_fea2, mid_fea1, mid_fea0, mid_fea, params["refine"])
    pred["segment"] = pred_seg
    # back to PyTorch NCHW, f32
    return {k: jnp.transpose(v.astype(jnp.float32), (0, 3, 1, 2)) for k, v in pred.items()}


# ----------------------------------------------------------------------------
if __name__ == "__main__":
    key = jax.random.PRNGKey(0)
    image = jax.random.uniform(key, (2, 3, 64, 64), jnp.float32)   # NCHW like PyTorch

    params = make_human_matting_params(seed=42)
    out = human_matting_forward(params, image, mask=None)

    alpha = jax.block_until_ready(out["alpha"])
    segment = jax.block_until_ready(out["segment"])
    assert alpha.shape == (2, 1, 64, 64)
    assert segment.shape == (2, 1, 64, 64)
    assert bool(jnp.all(jnp.isfinite(alpha))) and bool(jnp.all(jnp.isfinite(segment)))
    print("KERNEL_OK")
</pallas_src>

<mosaic_0001>
module attributes {stable_mosaic.version = 11 : i64} {
  func.func @_mm_kernel(%arg0: i32, %arg1: i32, %arg2: i32, %arg3: memref<128x147xbf16, #tpu.memory_space<vmem>>, %arg4: memref<147x64xbf16, #tpu.memory_space<vmem>>, %arg5: memref<1x64xf32, #tpu.memory_space<vmem>>, %arg6: memref<128x64xbf16, #tpu.memory_space<vmem>>, %arg7: memref<128x64xf32, #tpu.memory_space<vmem>>) attributes {dimension_semantics = [#tpu.dimension_semantics<parallel>, #tpu.dimension_semantics<parallel>, #tpu.dimension_semantics<arbitrary>], iteration_bounds = array<i64: 1, 1, 1>, scalar_prefetch = 0 : i64, scratch_operands = 1 : i64, tpu.core_type = #tpu.core_type<tc>, window_params = [{transform_indices = @transform_0, window_bounds = array<i64: 128, 147>}, {transform_indices = @transform_1, window_bounds = array<i64: 147, 64>}, {transform_indices = @transform_2, window_bounds = array<i64: 1, 64>}, {transform_indices = @transform_3, window_bounds = array<i64: 128, 64>}]} {
    %c0_i32 = arith.constant 0 : i32
    %0 = arith.cmpi eq, %arg2, %c0_i32 : i32
    %1 = arith.extui %0 : i1 to i32
    %c0_i32_0 = arith.constant 0 : i32
    %2 = arith.cmpi ne, %1, %c0_i32_0 : i32
    scf.if %2 {
      %cst_10 = arith.constant 0.000000e+00 : f32
      %12 = vector.broadcast %cst_10 : f32 to vector<128x64xf32>
      %c0_11 = arith.constant 0 : index
      %c0_12 = arith.constant 0 : index
      %13 = vector.load %arg7[%c0_11, %c0_12] : memref<128x64xf32, #tpu.memory_space<vmem>>, vector<128x64xf32>
      tpu.vector_store %arg7[%c0_11, %c0_12], %12 {strides = array<i32>} : memref<128x64xf32, #tpu.memory_space<vmem>>, vector<128x64xf32>,
    } else {
    }
    %c0 = arith.constant 0 : index
    %c0_1 = arith.constant 0 : index
    %3 = vector.load %arg7[%c0, %c0_1] : memref<128x64xf32, #tpu.memory_space<vmem>>, vector<128x64xf32>
    %c0_2 = arith.constant 0 : index
    %c0_3 = arith.constant 0 : index
    %4 = vector.load %arg3[%c0_2, %c0_3] : memref<128x147xbf16, #tpu.memory_space<vmem>>, vector<128x147xbf16>
    %c0_4 = arith.constant 0 : index
    %c0_5 = arith.constant 0 : index
    %5 = vector.load %arg4[%c0_4, %c0_5] : memref<147x64xbf16, #tpu.memory_space<vmem>>, vector<147x64xbf16>
    %cst = arith.constant dense<0.000000e+00> : vector<128x64xf32>
    %6 = tpu.matmul %4, %5, %cst {dimension_numbers = #tpu.dot_dimension_numbers<[1], [0], [0], [1], [0, 0, 1, 1], [], []>} : vector<128x147xbf16>, vector<147x64xbf16>, vector<128x64xf32> -> vector<128x64xf32>
    %7 = arith.addf %3, %6 : vector<128x64xf32>
    %c0_6 = arith.constant 0 : index
    %c0_7 = arith.constant 0 : index
    %8 = vector.load %arg7[%c0_6, %c0_7] : memref<128x64xf32, #tpu.memory_space<vmem>>, vector<128x64xf32>
    tpu.vector_store %arg7[%c0_6, %c0_7], %7 {strides = array<i32>} : memref<128x64xf32, #tpu.memory_space<vmem>>, vector<128x64xf32>,
    %c0_i32_8 = arith.constant 0 : i32
    %9 = arith.cmpi eq, %arg2, %c0_i32_8 : i32
    %10 = arith.extui %9 : i1 to i32
    %c0_i32_9 = arith.constant 0 : i32
    %11 = arith.cmpi ne, %10, %c0_i32_9 : i32
    scf.if %11 {
      %c0_10 = arith.constant 0 : index
      %c0_11 = arith.constant 0 : index
      %12 = vector.load %arg7[%c0_10, %c0_11] : memref<128x64xf32, #tpu.memory_space<vmem>>, vector<128x64xf32>
      %c0_12 = arith.constant 0 : index
      %c0_13 = arith.constant 0 : index
      %13 = vector.load %arg5[%c0_12, %c0_13] : memref<1x64xf32, #tpu.memory_space<vmem>>, vector<1x64xf32>
      %14 = vector.broadcast %13 : vector<1x64xf32> to vector<128x64xf32>
      %15 = arith.addf %12, %14 : vector<128x64xf32>
      %cst_14 = arith.constant 0.000000e+00 : f32
      %16 = vector.broadcast %cst_14 : f32 to vector<128x64xf32>
      %17 = arith.maximumf %15, %16 : vector<128x64xf32>
      %18 = arith.truncf %17 : vector<128x64xf32> to vector<128x64xbf16>
      %c0_15 = arith.constant 0 : index
      %c0_16 = arith.constant 0 : index
      %19 = vector.load %arg6[%c0_15, %c0_16] : memref<128x64xbf16, #tpu.memory_space<vmem>>, vector<128x64xbf16>
      tpu.vector_store %arg6[%c0_15, %c0_16], %18 {strides = array<i32>} : memref<128x64xbf16, #tpu.memory_space<vmem>>, vector<128x64xbf16>,
    } else {
    }
    return
  }
  func.func @transform_0(%arg0: i32, %arg1: i32, %arg2: i32) -> (i32, i32) {
    %c0_i32 = arith.constant 0 : i32
    return %arg0, %arg2 : i32, i32
  }
  func.func @transform_1(%arg0: i32, %arg1: i32, %arg2: i32) -> (i32, i32) {
    %c0_i32 = arith.constant 0 : i32
    return %arg2, %arg1 : i32, i32
  }
  func.func @transform_2(%arg0: i32, %arg1: i32, %arg2: i32) -> (i32, i32) {
    %c0_i32 = arith.constant 0 : i32
    %c0_i32_0 = arith.constant 0 : i32
    return %c0_i32, %arg1 : i32, i32
  }
  func.func @transform_3(%arg0: i32, %arg1: i32, %arg2: i32) -> (i32, i32) {
    %c0_i32 = arith.constant 0 : i32
    return %arg0, %arg1 : i32, i32
  }
}

</mosaic_0001>

<bundles_post_ra>
// kernel: tpu_custom_call.1
= control target key start
LH: loop header
LB: loop body
LE: loop exit
PB: predicated region body
PF: predicated region fallthrough
CT: control target
= control target key end

     0   :  { %vm241_vm0 = vcmask 1040384   ;;  %vm242_vm1 = vcmask 1041408   ;;  %v617_v2 = vmov 65535   ;;  %vm216_vm2 = vcmask 154624   ;;  %s896_s1 = inlined_call_operand.vmem [shape: bf16[147,64], index: 1, kind: input, shape index: {}]   ;;  %s897_s0 = inlined_call_operand.vmem [shape: bf16[128,147], index: 0, kind: input, shape index: {}]   ;;  %s898_s2 = inlined_call_operand.vmem [shape: f32[1,64], index: 2, kind: input, shape index: {}]   ;;  %s899_s3 = inlined_call_operand.vmem [shape: bf16[128,64], index: 3, kind: output, shape index: {}]  }
   0x1   :  { %v602_v0 = vld [vmem:[%s896_s1 + $0x38] sm:$0xff]  ;;  %v86_v1 = vld [vmem:[%s896_s1 + $0x48] sm:$0x3]  ;;  %v243_v3 = vsel %vm241_vm0, 4294967295, %v617_v2  ;;  %v601_v5 = vld [vmem:[%s896_s1 + $0x30] sm:$0xff]  ;;  %vm19_vm3 = vcmask 523264  }
   0x2   :  { %v196_v4 = vunpack.c.l.b16 %v86_v1  ;;  %248 = vmatpush.bf16.msra.mxu0 %v602_v0  ;;  %604 = vmatpush.bf16.msra.mxu2 %v602_v0  ;;  %v244_v6 = vsel %vm242_vm1, %v243_v3, 0  ;;  %v600_v9 = vld [vmem:[%s896_s1 + $0x28] sm:$0xff]  ;;  %v603_v10 = vld [vmem:[%s896_s1 + $0x40] sm:$0xff]  ;;  %v589_v13 = vld [vmem:[%s897_s0 + $0x54] sm:$0xf]  ;;  %v618_v0 = vmov 0.0  }
   0x3   :  { %v579_v11 = vld [vmem:[%s897_s0 + $0x4] sm:$0xf]  ;;  %v475_v12 = vld [vmem:[%s897_s0 + $0x8] sm:$0xf0]  ;;  %v515_v14 = vld [vmem:[%s897_s0 + $0x58] sm:$0xf0] }
   0x4   :  { %v206_v7 = vpack.c.b16 %v196_v4, %v196_v4  ;;  %v478_v15 = vor.u32 %v579_v11, %v475_v12  ;;  %v599_v16 = vld [vmem:[%s896_s1 + $0x20] sm:$0xff]  ;;  %v518_v17 = vor.u32 %v589_v13, %v515_v14  ;;  %v598_v18 = vld [vmem:[%s896_s1 + $0x18] sm:$0xff]  ;;  %v597_v19 = vld [vmem:[%s896_s1 + $0x10] sm:$0xff]  ;;  %20 = vst.msk [vmem:[#allocation2] sm:$0xff] %vm19_vm3, %v618_v0  ;;  %vm450_vm4 = vcmask 519168  }
   0x5   :  { %v596_v20 = vld [vmem:[%s896_s1 + $0x8] sm:$0xff]  ;;  %v581_v21 = vld [vmem:[%s897_s0 + $0x14] sm:$0xf]  ;;  %v483_v22 = vld [vmem:[%s897_s0 + $0x18] sm:$0xf0]  ;;  %21 = vst.msk [vmem:[#allocation2 + $0x8] sm:$0xff] %vm19_vm3, %v618_v0 }
   0x6   :  { %v246_v8 = vand.u32 %v244_v6, %v206_v7  ;;  %249 = vmatpush.bf16.msra.mxu0 %v601_v5  ;;  %605 = vmatpush.bf16.msra.mxu2 %v601_v5  ;;  %v591_v23 = vld [vmem:[%s897_s0 + $0x64] sm:$0xf]  ;;  %v523_v24 = vld [vmem:[%s897_s0 + $0x68] sm:$0xf0]  ;;  %v486_v25 = vor.u32 %v581_v21, %v483_v22  ;;  %v473_v27 = vld [vmem:[%s897_s0] sm:$0xf] }
   0x7   :  { %v595_v26 = vld [vmem:[%s896_s1] sm:$0xff]  ;;  %v580_v28 = vld [vmem:[%s897_s0 + $0x4] sm:$0xf0]  ;;  %v526_v31 = vor.u32 %v591_v23, %v523_v24  ;;  %v491_v35 = vld [vmem:[%s897_s0 + $0x28] sm:$0xf0]  ;;  %22 = vst.msk [vmem:[#allocation2 + $0x10] sm:$0xff] %vm19_vm3, %v618_v0 }
   0x8   :  { %303 = vmatpush.bf16.msra.mxu1 %v246_v8  ;;  %612 = vmatpush.bf16.msra.mxu3 %v246_v8  ;;  %v505_v29 = vld [vmem:[%s897_s0 + $0x40] sm:$0xf]  ;;  %v588_v30 = vld [vmem:[%s897_s0 + $0x44] sm:$0xf0]  ;;  %v474_v32 = vor.u32 %v580_v28, %v473_v27  ;;  %v583_v34 = vld [vmem:[%s897_s0 + $0x24] sm:$0xf] }
   0x9   :  { %v506_v33 = vor.u32 %v588_v30, %v505_v29  ;;  %v593_v36 = vld [vmem:[%s897_s0 + $0x74] sm:$0xf]  ;;  %v531_v37 = vld [vmem:[%s897_s0 + $0x78] sm:$0xf0]  ;;  %v494_v38 = vor.u32 %v583_v34, %v491_v35  ;;  %v481_v39 = vld [vmem:[%s897_s0 + $0x10] sm:$0xf] }
   0xa   :  { %250 = vmatpush.bf16.msra.mxu0 %v600_v9  ;;  %606 = vmatpush.bf16.msra.mxu2 %v600_v9  ;;  %v582_v40 = vld [vmem:[%s897_s0 + $0x14] sm:$0xf0]  ;;  %v513_v41 = vld [vmem:[%s897_s0 + $0x50] sm:$0xf]  ;;  %v534_v43 = vor.u32 %v593_v36, %v531_v37  ;;  %v585_v46 = vld [vmem:[%s897_s0 + $0x34] sm:$0xf] }
   0xb   :  { %v590_v42 = vld [vmem:[%s897_s0 + $0x54] sm:$0xf0]  ;;  %v482_v44 = vor.u32 %v582_v40, %v481_v39  ;;  %v499_v47 = vld [vmem:[%s897_s0 + $0x38] sm:$0xf0]  ;;  %v489_v49 = vld [vmem:[%s897_s0 + $0x20] sm:$0xf] }
   0xc   :  { %304 = vmatpush.bf16.msra.mxu1 %v603_v10  ;;  %613 = vmatpush.bf16.msra.mxu3 %v603_v10  ;;  %v514_v45 = vor.u32 %v590_v42, %v513_v41  ;;  %v502_v48 = vor.u32 %v585_v46, %v499_v47  ;;  %v584_v50 = vld [vmem:[%s897_s0 + $0x24] sm:$0xf0]  ;;  %v521_v51 = vld [vmem:[%s897_s0 + $0x60] sm:$0xf]  ;;  %v587_v55 = vld [vmem:[%s897_s0 + $0x44] sm:$0xf] }
   0xd   :  { %v592_v52 = vld [vmem:[%s897_s0 + $0x64] sm:$0xf0]  ;;  %v490_v53 = vor.u32 %v584_v50, %v489_v49  ;;  %v507_v56 = vld [vmem:[%s897_s0 + $0x48] sm:$0xf0]  ;;  %v497_v58 = vld [vmem:[%s897_s0 + $0x30] sm:$0xf] }
   0xe   :  { %251 = vmatpush.bf16.msra.mxu0 %v599_v16  ;;  %607 = vmatpush.bf16.msra.mxu2 %v599_v16  ;;  %v522_v54 = vor.u32 %v592_v52, %v521_v51  ;;  %v510_v57 = vor.u32 %v587_v55, %v507_v56  ;;  %v586_v59 = vld [vmem:[%s897_s0 + $0x34] sm:$0xf0]  ;;  %v529_v60 = vld [vmem:[%s897_s0 + $0x70] sm:$0xf]  ;;  %23 = vst.msk [vmem:[#allocation2 + $0x18] sm:$0xff] %vm19_vm3, %v618_v0  ;;  %v36_v4 = vld [vmem:[#allocation2] sm:$0xff] }
   0xf   :  { %571 = vmatmul.msk.bf16.vlgmr.msra.gmra.mxu1 %vm216_vm2, %v478_v15  ;;  %576 = vmatmul.msk.bf16.vlgmr.msra.gmra.mxu3 %vm216_vm2, %v518_v17  ;;  %v594_v61 = vld [vmem:[%s897_s0 + $0x74] sm:$0xf0]  ;;  %v498_v62 = vor.u32 %v586_v59, %v497_v58  ;;  %24 = vst.msk [vmem:[#allocation2 + $0x20] sm:$0xff] %vm19_vm3, %v618_v0  ;;  %v37_v10 = vld [vmem:[#allocation2 + $0x8] sm:$0xff]  ;;  %v795_v12 = vld [vmem:[%s898_s2] ss:$0 sm:$0xff] }
  0x10   :  { %v530_v63 = vor.u32 %v594_v61, %v529_v60  ;;  %25 = vst.msk [vmem:[#allocation2 + $0x28] sm:$0xff] %vm19_vm3, %v618_v0  ;;  %v38_v21 = vld [vmem:[#allocation2 + $0x10] sm:$0xff] }
  0x11   :  { %26 = vst.msk [vmem:[#allocation2 + $0x30] sm:$0xff] %vm19_vm3, %v618_v0 }
  0x12   :  { %252 = vmatpush.bf16.msra.mxu0 %v598_v18  ;;  %608 = vmatpush.bf16.msra.mxu2 %v598_v18  ;;  %27 = vst.msk [vmem:[#allocation2 + $0x38] sm:$0xff] %vm19_vm3, %v618_v0 }
  0x13   :  { %28 = vst.msk [vmem:[#allocation2 + $0x40] sm:$0xff] %vm19_vm3, %v618_v0 }
  0x14   :  { %29 = vst.msk [vmem:[#allocation2 + $0x48] sm:$0xff] %vm19_vm3, %v618_v0 }
  0x15   :  { %30 = vst.msk [vmem:[#allocation2 + $0x50] sm:$0xff] %vm19_vm3, %v618_v0  ;;  %v39_v34 = vld [vmem:[#allocation2 + $0x18] sm:$0xff] }
  0x16   :  { %253 = vmatpush.bf16.msra.mxu0 %v597_v19  ;;  %609 = vmatpush.bf16.msra.mxu2 %v597_v19  ;;  %31 = vst.msk [vmem:[#allocation2 + $0x58] sm:$0xff] %vm19_vm3, %v618_v0  ;;  %v40_v47 = vld [vmem:[#allocation2 + $0x20] sm:$0xff] }
  0x17   :  { %32 = vst.msk [vmem:[#allocation2 + $0x60] sm:$0xff] %vm19_vm3, %v618_v0 }
  0x18   :  { %33 = vst.msk [vmem:[#allocation2 + $0x68] sm:$0xff] %vm19_vm3, %v618_v0 }
  0x19   :  { %34 = vst.msk [vmem:[#allocation2 + $0x70] sm:$0xff] %vm19_vm3, %v618_v0 }
  0x1a   :  { %254 = vmatpush.bf16.msra.mxu0 %v596_v20  ;;  %610 = vmatpush.bf16.msra.mxu2 %v596_v20  ;;  %35 = vst.msk [vmem:[#allocation2 + $0x78] sm:$0xff] %vm19_vm3, %v618_v0 }
  0x1c   :  { %v46_v30 = vld [vmem:[#allocation2 + $0x50] sm:$0xff] }
  0x1e   :  { %255 = vmatpush.bf16.msra.mxu0 %v595_v26  ;;  %611 = vmatpush.bf16.msra.mxu2 %v595_v26  ;;  %v48_v61 = vld [vmem:[#allocation2 + $0x60] sm:$0xff] }
  0x1f   :  { %572 = vmatmul.msk.bf16.gmra.mxu1 %vm216_vm2, %v486_v25  ;;  %577 = vmatmul.msk.bf16.gmra.mxu3 %vm216_vm2, %v526_v31 }
  0x21   :  { %256 = vmatmul.bf16.vlgmr.msra.gmra.mxu0 %v474_v32  ;;  %276 = vmatmul.bf16.vlgmr.msra.gmra.mxu2 %v506_v33 }
  0x2f   :  { %573 = vmatmul.msk.bf16.gmra.mxu1 %vm216_vm2, %v494_v38  ;;  %578 = vmatmul.msk.bf16.gmra.mxu3 %vm216_vm2, %v534_v43 }
  0x31   :  { %261 = vmatmul.bf16.gmra.mxu0 %v482_v44  ;;  %281 = vmatmul.bf16.gmra.mxu2 %v514_v45  ;;  %v47_v44 = vld [vmem:[#allocation2 + $0x58] sm:$0xff] }
  0x3f   :  { %574 = vmatmul.msk.bf16.gmra.mxu1 %vm216_vm2, %v502_v48 }
  0x41   :  { %266 = vmatmul.bf16.gmra.mxu0 %v490_v53  ;;  %286 = vmatmul.bf16.gmra.mxu2 %v522_v54 }
  0x4f   :  { %575 = vmatmul.msk.bf16.gmra.mxu1 %vm216_vm2, %v510_v57 }
  0x51   :  { %271 = vmatmul.bf16.gmra.mxu0 %v498_v62  ;;  %291 = vmatmul.bf16.gmra.mxu2 %v530_v63 }
  0x8c   :  { %v306_v1 = vpop.f32.mrf.mxu1 }
  0x92   :  { %v331_v18 = vpop.f32.mrf.mxu3 }
  0x94   :  { %v308_v2 = vpop.f32.mrf.mxu1 }
  0x9a   :  { %v333_v32 = vpop.f32.mrf.mxu3 }
  0x9c   :  { %v311_v3 = vpop.f32.mrf.mxu1 }
  0x9e   :  { %v257_v5 = vpop.f32.mrf.mxu0 }
  0x9f   :  { %v307_v6 = vadd.f32 %v306_v1, %v257_v5  ;;  %v41_v1 = vld [vmem:[#allocation2 + $0x28] sm:$0xff] }
  0xa1   :  { %v346_v7 = vadd.f32 %v307_v6, %v36_v4 }
  0xa2   :  { %v336_v50 = vpop.f32.mrf.mxu3 }
  0xa3   :  { %363 = vst.msk [vmem:[#allocation2] sm:$0xff] %vm19_vm3, %v346_v7 }
  0xa4   :  { %v313_v8 = vpop.f32.mrf.mxu1  ;;  %v790_v9 = vpop.f32.mrf.mxu2 }
  0xa6   :  { %v259_v11 = vpop.f32.mrf.mxu0 }
  0xa7   :  { %v309_v13 = vadd.f32 %v308_v2, %v259_v11 }
  0xa9   :  { %v347_v14 = vadd.f32 %v309_v13, %v37_v10 }
  0xaa   :  { %v382_v15 = vld [vmem:[#allocation2] sm:$0xff]  ;;  %v338_v7 = vpop.f32.mrf.mxu3 }
  0xab   :  { %v402_v16 = vadd.f32 %v795_v12, %v382_v15  ;;  %364 = vst.msk [vmem:[#allocation2 + $0x8] sm:$0xff] %vm19_vm3, %v347_v14  ;;  %v44_v14 = vld [vmem:[#allocation2 + $0x40] sm:$0xff] }
  0xac   :  { %v316_v17 = vpop.f32.mrf.mxu1  ;;  %v799_v20 = vpop.f32.mrf.mxu2 }
  0xad   :  { %v418_v19 = vmax.f32 %v402_v16, 0.0 }
  0xae   :  { %v262_v22 = vpop.f32.mrf.mxu0 }
  0xaf   :  { %v434_v23 = vpack.c.bf16 %v418_v19, %v418_v19  ;;  %v312_v24 = vadd.f32 %v311_v3, %v262_v22  ;;  %v49_v19 = vld [vmem:[#allocation2 + $0x68] sm:$0xff] }
  0xb1   :  { %451 = vst.msk [vmem:[%s899_s3] sm:$0xf] %vm450_vm4, %v434_v23  ;;  %v348_v25 = vadd.f32 %v312_v24, %v38_v21 }
  0xb2   :  { %v383_v26 = vld [vmem:[#allocation2 + $0x8] sm:$0xff] }
  0xb3   :  { %v403_v27 = vadd.f32 %v795_v12, %v383_v26  ;;  %365 = vst.msk [vmem:[#allocation2 + $0x10] sm:$0xff] %vm19_vm3, %v348_v25  ;;  %v42_v25 = vld [vmem:[#allocation2 + $0x30] sm:$0xff] }
  0xb4   :  { %v318_v28 = vpop.f32.mrf.mxu1  ;;  %v282_v31 = vpop.f32.mrf.mxu2 }
  0xb5   :  { %v419_v29 = vmax.f32 %v403_v27, 0.0  ;;  %v332_v33 = vadd.f32 %v331_v18, %v282_v31 }
  0xb6   :  { %v264_v35 = vpop.f32.mrf.mxu0 }
  0xb7   :  { %v435_v36 = vpack.c.bf16 %v419_v29, %v419_v29  ;;  %v314_v37 = vadd.f32 %v313_v8, %v264_v35  ;;  %v356_v38 = vadd.f32 %v332_v33, %v46_v30  ;;  %v45_v35 = vld [vmem:[#allocation2 + $0x48] sm:$0xff] }
  0xb9   :  { %452 = vst.msk [vmem:[%s899_s3 + $0x4] sm:$0xf] %vm450_vm4, %v435_v36  ;;  %v349_v39 = vadd.f32 %v314_v37, %v39_v34  ;;  %v341_v34 = vpop.f32.mrf.mxu3 }
  0xba   :  { %v384_v40 = vld [vmem:[#allocation2 + $0x10] sm:$0xff]  ;;  %373 = vst.msk [vmem:[#allocation2 + $0x50] sm:$0xff] %vm19_vm3, %v356_v38 }
  0xbb   :  { %v404_v41 = vadd.f32 %v795_v12, %v384_v40  ;;  %366 = vst.msk [vmem:[#allocation2 + $0x18] sm:$0xff] %vm19_vm3, %v349_v39  ;;  %v50_v40 = vld [vmem:[#allocation2 + $0x70] sm:$0xff] }
  0xbc   :  { %v321_v42 = vpop.f32.mrf.mxu1  ;;  %v284_v45 = vpop.f32.mrf.mxu2 }
  0xbd   :  { %v420_v43 = vmax.f32 %v404_v41, 0.0  ;;  %v334_v46 = vadd.f32 %v333_v32, %v284_v45  ;;  %v43_v45 = vld [vmem:[#allocation2 + $0x38] sm:$0xff] }
  0xbe   :  { %v267_v48 = vpop.f32.mrf.mxu0 }
  0xbf   :  { %v436_v49 = vpack.c.bf16 %v420_v43, %v420_v43  ;;  %v317_v51 = vadd.f32 %v316_v17, %v267_v48  ;;  %v357_v52 = vadd.f32 %v334_v46, %v47_v44 }
  0xc1   :  { %453 = vst.msk [vmem:[%s899_s3 + $0x8] sm:$0xf] %vm450_vm4, %v436_v49  ;;  %v392_v53 = vld [vmem:[#allocation2 + $0x50] sm:$0xff]  ;;  %v350_v54 = vadd.f32 %v317_v51, %v40_v47 }
  0xc2   :  { %v412_v55 = vadd.f32 %v795_v12, %v392_v53  ;;  %v385_v56 = vld [vmem:[#allocation2 + $0x18] sm:$0xff]  ;;  %374 = vst.msk [vmem:[#allocation2 + $0x58] sm:$0xff] %vm19_vm3, %v357_v52 }
  0xc3   :  { %v405_v57 = vadd.f32 %v795_v12, %v385_v56  ;;  %367 = vst.msk [vmem:[#allocation2 + $0x20] sm:$0xff] %vm19_vm3, %v350_v54 }
  0xc4   :  { %v323_v58 = vpop.f32.mrf.mxu1  ;;  %v428_v59 = vmax.f32 %v412_v55, 0.0  ;;  %v287_v62 = vpop.f32.mrf.mxu2 }
  0xc5   :  { %v421_v60 = vmax.f32 %v405_v57, 0.0  ;;  %v337_v0 = vadd.f32 %v336_v50, %v287_v62 }
  0xc6   :  { %v444_v63 = vpack.c.bf16 %v428_v59, %v428_v59  ;;  %v269_v2 = vpop.f32.mrf.mxu0  ;;  %v51_v59 = vld [vmem:[#allocation2 + $0x78] sm:$0xff] }
  0xc7   :  { %v437_v3 = vpack.c.bf16 %v421_v60, %v421_v60  ;;  %v319_v4 = vadd.f32 %v318_v28, %v269_v2  ;;  %v358_v5 = vadd.f32 %v337_v0, %v48_v61 }
  0xc8   :  { %461 = vst.msk [vmem:[%s899_s3 + $0x28] sm:$0xf] %vm450_vm4, %v444_v63 }
  0xc9   :  { %454 = vst.msk [vmem:[%s899_s3 + $0xc] sm:$0xf] %vm450_vm4, %v437_v3  ;;  %v393_v6 = vld [vmem:[#allocation2 + $0x58] sm:$0xff]  ;;  %v351_v8 = vadd.f32 %v319_v4, %v41_v1 }
  0xca   :  { %v413_v10 = vadd.f32 %v795_v12, %v393_v6  ;;  %v386_v11 = vld [vmem:[#allocation2 + $0x20] sm:$0xff]  ;;  %375 = vst.msk [vmem:[#allocation2 + $0x60] sm:$0xff] %vm19_vm3, %v358_v5 }
  0xcb   :  { %v406_v13 = vadd.f32 %v795_v12, %v386_v11  ;;  %368 = vst.msk [vmem:[#allocation2 + $0x28] sm:$0xff] %vm19_vm3, %v351_v8 }
  0xcc   :  { %v326_v15 = vpop.f32.mrf.mxu1  ;;  %v429_v16 = vmax.f32 %v413_v10, 0.0  ;;  %v289_v21 = vpop.f32.mrf.mxu2 }
  0xcd   :  { %v327_v17 = vadd.f32 %v326_v15, %v790_v9  ;;  %v422_v18 = vmax.f32 %v406_v13, 0.0  ;;  %v339_v24 = vadd.f32 %v338_v7, %v289_v21 }
  0xce   :  { %v445_v22 = vpack.c.bf16 %v429_v16, %v429_v16  ;;  %v272_v26 = vpop.f32.mrf.mxu0 }
  0xcf   :  { %v354_v23 = vadd.f32 %v327_v17, %v44_v14  ;;  %v438_v27 = vpack.c.bf16 %v422_v18, %v422_v18  ;;  %v322_v28 = vadd.f32 %v321_v42, %v272_v26  ;;  %v359_v29 = vadd.f32 %v339_v24, %v49_v19 }
  0xd0   :  { %462 = vst.msk [vmem:[%s899_s3 + $0x2c] sm:$0xf] %vm450_vm4, %v445_v22 }
  0xd1   :  { %455 = vst.msk [vmem:[%s899_s3 + $0x10] sm:$0xf] %vm450_vm4, %v438_v27  ;;  %v394_v9 = vld [vmem:[#allocation2 + $0x60] sm:$0xff]  ;;  %v352_v30 = vadd.f32 %v322_v28, %v42_v25 }
  0xd2   :  { %v414_v31 = vadd.f32 %v795_v12, %v394_v9  ;;  %v387_v32 = vld [vmem:[#allocation2 + $0x28] sm:$0xff]  ;;  %371 = vst.msk [vmem:[#allocation2 + $0x40] sm:$0xff] %vm19_vm3, %v354_v23 }
  0xd3   :  { %v407_v33 = vadd.f32 %v795_v12, %v387_v32  ;;  %376 = vst.msk [vmem:[#allocation2 + $0x68] sm:$0xff] %vm19_vm3, %v359_v29 }
  0xd4   :  { %v328_v36 = vpop.f32.mrf.mxu1  ;;  %v430_v37 = vmax.f32 %v414_v31, 0.0  ;;  %369 = vst.msk [vmem:[#allocation2 + $0x30] sm:$0xff] %vm19_vm3, %v352_v30  ;;  %v292_v41 = vpop.f32.mrf.mxu2 }
  0xd5   :  { %v329_v38 = vadd.f32 %v328_v36, %v799_v20  ;;  %v423_v39 = vmax.f32 %v407_v33, 0.0  ;;  %v342_v44 = vadd.f32 %v341_v34, %v292_v41 }
  0xd6   :  { %v446_v42 = vpack.c.bf16 %v430_v37, %v430_v37  ;;  %v274_v46 = vpop.f32.mrf.mxu0 }
  0xd7   :  { %v355_v43 = vadd.f32 %v329_v38, %v45_v35  ;;  %v439_v47 = vpack.c.bf16 %v423_v39, %v423_v39  ;;  %v324_v48 = vadd.f32 %v323_v58, %v274_v46  ;;  %v360_v49 = vadd.f32 %v342_v44, %v50_v40  ;;  %v343_v58 = vpop.f32.mrf.mxu3 }
  0xd8   :  { %463 = vst.msk [vmem:[%s899_s3 + $0x30] sm:$0xf] %vm450_vm4, %v446_v42 }
  0xd9   :  { %456 = vst.msk [vmem:[%s899_s3 + $0x14] sm:$0xf] %vm450_vm4, %v439_v47  ;;  %v390_v20 = vld [vmem:[#allocation2 + $0x40] sm:$0xff]  ;;  %v353_v50 = vadd.f32 %v324_v48, %v43_v45 }
  0xda   :  { %v410_v51 = vadd.f32 %v795_v12, %v390_v20  ;;  %v395_v52 = vld [vmem:[#allocation2 + $0x68] sm:$0xff]  ;;  %372 = vst.msk [vmem:[#allocation2 + $0x48] sm:$0xff] %vm19_vm3, %v355_v43 }
  0xdb   :  { %v415_v53 = vadd.f32 %v795_v12, %v395_v52  ;;  %v388_v54 = vld [vmem:[#allocation2 + $0x30] sm:$0xff]  ;;  %377 = vst.msk [vmem:[#allocation2 + $0x70] sm:$0xff] %vm19_vm3, %v360_v49 }
  0xdc   :  { %v426_v55 = vmax.f32 %v410_v51, 0.0  ;;  %v408_v56 = vadd.f32 %v795_v12, %v388_v54  ;;  %370 = vst.msk [vmem:[#allocation2 + $0x38] sm:$0xff] %vm19_vm3, %v353_v50  ;;  %v294_v60 = vpop.f32.mrf.mxu2 }
  0xdd   :  { %v431_v57 = vmax.f32 %v415_v53, 0.0  ;;  %v344_v63 = vadd.f32 %v343_v58, %v294_v60 }
  0xde   :  { %v442_v61 = vpack.c.bf16 %v426_v55, %v426_v55  ;;  %v424_v62 = vmax.f32 %v408_v56, 0.0 }
  0xdf   :  { %v447_v0 = vpack.c.bf16 %v431_v57, %v431_v57  ;;  %v361_v2 = vadd.f32 %v344_v63, %v51_v59 }
  0xe0   :  { %459 = vst.msk [vmem:[%s899_s3 + $0x20] sm:$0xf] %vm450_vm4, %v442_v61  ;;  %v440_v1 = vpack.c.bf16 %v424_v62, %v424_v62 }
  0xe1   :  { %464 = vst.msk [vmem:[%s899_s3 + $0x34] sm:$0xf] %vm450_vm4, %v447_v0  ;;  %v391_v3 = vld [vmem:[#allocation2 + $0x48] sm:$0xff] }
  0xe2   :  { %457 = vst.msk [vmem:[%s899_s3 + $0x18] sm:$0xf] %vm450_vm4, %v440_v1  ;;  %v411_v4 = vadd.f32 %v795_v12, %v391_v3  ;;  %v396_v5 = vld [vmem:[#allocation2 + $0x70] sm:$0xff] }
  0xe3   :  { %v416_v6 = vadd.f32 %v795_v12, %v396_v5  ;;  %v389_v7 = vld [vmem:[#allocation2 + $0x38] sm:$0xff]  ;;  %378 = vst.msk [vmem:[#allocation2 + $0x78] sm:$0xff] %vm19_vm3, %v361_v2 }
  0xe4   :  { %v427_v8 = vmax.f32 %v411_v4, 0.0  ;;  %v409_v10 = vadd.f32 %v795_v12, %v389_v7 }
  0xe5   :  { %v432_v11 = vmax.f32 %v416_v6, 0.0 }
  0xe6   :  { %v443_v13 = vpack.c.bf16 %v427_v8, %v427_v8  ;;  %v425_v14 = vmax.f32 %v409_v10, 0.0 }
  0xe7   :  { %v448_v15 = vpack.c.bf16 %v432_v11, %v432_v11 }
  0xe8   :  { %460 = vst.msk [vmem:[%s899_s3 + $0x24] sm:$0xf] %vm450_vm4, %v443_v13  ;;  %v441_v16 = vpack.c.bf16 %v425_v14, %v425_v14 }
  0xe9   :  { %465 = vst.msk [vmem:[%s899_s3 + $0x38] sm:$0xf] %vm450_vm4, %v448_v15 }
  0xea   :  { %458 = vst.msk [vmem:[%s899_s3 + $0x1c] sm:$0xf] %vm450_vm4, %v441_v16  ;;  %v397_v17 = vld [vmem:[#allocation2 + $0x78] sm:$0xff] }
  0xeb   :  { %v417_v18 = vadd.f32 %v795_v12, %v397_v17 }
  0xed   :  { %v433_v19 = vmax.f32 %v417_v18, 0.0 }
  0xef   :  { %v449_v21 = vpack.c.bf16 %v433_v19, %v433_v19 }
  0xf1   :  { %466 = vst.msk [vmem:[%s899_s3 + $0x3c] sm:$0xf] %vm450_vm4, %v449_v21 }

</bundles_post_ra>
